<compile_context>
chip_gen: v5e
topology: v5e:2x2
jax: 0.10.0
libtpu: 0.0.40
codegen_flags: <defaults>
</compile_context>

<pallas_src>
import math
from functools import partial

import jax
import jax.numpy as jnp
from jax.experimental import pallas as pl
from jax.experimental.pallas import tpu as pltpu


# ---------------------------------------------------------------------------
# Fused kernel: whole forward pass (both batch elements) in ONE grid step
# ---------------------------------------------------------------------------

def _mha_fused_kernel(x_ref, wq_ref, wk_ref, wv_ref, w_out_ref, b_out_ref,
                      bias_ref, o_ref, *, num_heads, head_dim):
    # x_ref:    (B*T, C)        both batch elements, row-packed
    # wq/wk/wv: (H, C, D)       per-head projection weights (q pre-scaled)
    # w_out:    (C, C)
    # b_out:    (1, C)
    # bias:     (B*T, B*T)      block-diagonal permuted-causal bias (-1e9 masked)
    # o_ref:    (B*T, C)
    x2d = x_ref[...]                                   # (BT, C)
    bias = bias_ref[...]                               # (BT, BT)
    w_out = w_out_ref[...]                             # (C, C)

    y = None
    for h in range(num_heads):                         # H=4, fully unrolled
        lo = h * head_dim
        hi = lo + head_dim

        # Per-head projections: weight selected via leading-axis ref index
        # (no lane slicing of activations), standard MXU matmuls.
        qh = jnp.dot(x2d, wq_ref[h], preferred_element_type=jnp.float32)  # (BT, D)
        kh = jnp.dot(x2d, wk_ref[h], preferred_element_type=jnp.float32)  # (BT, D)
        vh = jnp.dot(x2d, wv_ref[h], preferred_element_type=jnp.float32)  # (BT, D)

        # Scores over all B*T rows; cross-batch entries are killed by the
        # block-diagonal -1e9 bias, so per-batch softmax semantics hold.
        s = jnp.einsum("td,ud->tu", qh, kh,
                       preferred_element_type=jnp.float32) + bias         # (BT, BT)
        m = jnp.max(s, axis=-1, keepdims=True)
        e = jnp.exp(s - m)
        p = e * pl.reciprocal(jnp.sum(e, axis=-1, keepdims=True),
                              approx=True)             # EUP vrcp (free slot)

        oh = jnp.dot(p, vh, preferred_element_type=jnp.float32)           # (BT, D)

        # Head merge + out_proj: sublane-aligned row slice of w_out;
        # accumulator initialised from the h=0 matmul (no zeros init).
        yh = jnp.dot(oh, w_out[lo:hi, :], preferred_element_type=jnp.float32)
        y = yh if y is None else y + yh

    o_ref[...] = y + b_out_ref[...]                    # (1, C) broadcast add


# ---------------------------------------------------------------------------
# Host-side preparation (hoisted out of the per-call path; do once per perm)
# ---------------------------------------------------------------------------

def prepare_mha_inputs(params, perm, batch, seq_len, num_heads):
    C = params["w_out"].shape[0]
    H, D, T, B = num_heads, C // num_heads, seq_len, batch
    scale = 1.0 / math.sqrt(D)

    w_qkv = params["w_qkv"]                            # (C, 3C)

    def stack_heads(w):                                # (C, C) -> (H, C, D)
        return w.reshape(C, H, D).transpose(1, 0, 2)

    wq_h = stack_heads(w_qkv[:, :C] * scale)           # scale folded into q
    wk_h = stack_heads(w_qkv[:, C:2 * C])
    wv_h = stack_heads(w_qkv[:, 2 * C:])

    # Permuted causal bias, replicated into a block-diagonal (B*T, B*T) bias
    # so both batch elements can share one score matrix per head.
    tril = jnp.tril(jnp.ones((T, T), dtype=bool))
    bias_small = jnp.where(tril[:, perm], 0.0, -1e9).astype(jnp.float32)   # (T, T)
    row_b = jnp.arange(B * T) // T
    same_batch = row_b[:, None] == row_b[None, :]
    bias_big = jnp.where(same_batch, jnp.tile(bias_small, (B, B)),
                         jnp.float32(-1e9))                               # (BT, BT)

    return {
        "wq_h": wq_h, "wk_h": wk_h, "wv_h": wv_h,
        "w_out": params["w_out"],
        "b_out": params["b_out"].reshape(1, C),
        "attn_bias": bias_big,
    }


# ---------------------------------------------------------------------------
# Forward wrapper: single pallas_call, single grid step
# ---------------------------------------------------------------------------

def random_causal_mha_forward(x, prep, num_heads):
    B, T, C = x.shape
    D = C // num_heads
    BT = B * T
    x2d = x.reshape(BT, C)

    kernel = partial(_mha_fused_kernel, num_heads=num_heads, head_dim=D)

    # dropout p = 0.0 -> identity (no kernel needed)
    out2d = pl.pallas_call(
        kernel,
        out_shape=jax.ShapeDtypeStruct((BT, C), jnp.float32),
        grid=(1,),                                     # collapsed batch grid
        in_specs=[
            pl.BlockSpec((BT, C), lambda i: (0, 0)),                 # x (both batches)
            pl.BlockSpec((num_heads, C, D), lambda i: (0, 0, 0)),    # wq per head
            pl.BlockSpec((num_heads, C, D), lambda i: (0, 0, 0)),    # wk per head
            pl.BlockSpec((num_heads, C, D), lambda i: (0, 0, 0)),    # wv per head
            pl.BlockSpec((C, C), lambda i: (0, 0)),                  # w_out
            pl.BlockSpec((1, C), lambda i: (0, 0)),                  # b_out
            pl.BlockSpec((BT, BT), lambda i: (0, 0)),                # attn bias
        ],
        out_specs=pl.BlockSpec((BT, C), lambda i: (0, 0)),
    )(x2d, prep["wq_h"], prep["wk_h"], prep["wv_h"],
      prep["w_out"], prep["b_out"], prep["attn_bias"])

    return out2d.reshape(B, T, C)


# ---------------------------------------------------------------------------
# Pure-JAX reference (mirrors the PyTorch module)
# ---------------------------------------------------------------------------

def reference_forward(x, params, perm, num_heads):
    B, T, C = x.shape
    H = num_heads
    D = C // H
    qkv = x @ params["w_qkv"]
    q, k, v = jnp.split(qkv, 3, axis=-1)
    q = q.reshape(B, T, H, D).transpose(0, 2, 1, 3)
    k = k.reshape(B, T, H, D).transpose(0, 2, 1, 3)
    v = v.reshape(B, T, H, D).transpose(0, 2, 1, 3)
    tril = jnp.tril(jnp.ones((T, T), dtype=bool))
    bias = (~tril[:, perm]).astype(jnp.float32) * (-1e9)
    s = jnp.einsum("bhtd,bhsd->bhts", q, k) / math.sqrt(D) + bias
    p = jax.nn.softmax(s, axis=-1)
    o = jnp.einsum("bhts,bhsd->bhtd", p, v)
    o = o.transpose(0, 2, 1, 3).reshape(B, T, C)
    return o @ params["w_out"] + params["b_out"]


# ---------------------------------------------------------------------------
# Main
# ---------------------------------------------------------------------------

if __name__ == "__main__":
    B, T, C, H = 2, 8, 32, 4  # embed_dim=32, num_heads=4, head_dim=8

    key = jax.random.PRNGKey(0)
    k_x, k_qkv, k_out_w, k_out_b, k_perm = jax.random.split(key, 5)

    x = jax.random.normal(k_x, (B, T, C), dtype=jnp.float32)

    # Deterministic parameter init (synthetic, not a checkpoint load).
    # torch Linear weight is (out, in); we store the transposed (in, out) layout.
    params = {
        "w_qkv": 0.02 * jax.random.normal(k_qkv, (C, 3 * C), dtype=jnp.float32),
        "w_out": 0.02 * jax.random.normal(k_out_w, (C, C), dtype=jnp.float32),
        "b_out": 0.02 * jax.random.normal(k_out_b, (C,), dtype=jnp.float32),
    }

    # TODO(synk): torch.randperm uses the torch device RNG; reproduced here with a
    # deterministic jax.random.permutation (same distribution, different stream).
    perm = jax.random.permutation(k_perm, T)

    # Host-side prep hoisted out of the per-call path (done once per perm).
    prep = prepare_mha_inputs(params, perm, B, T, H)

    out = random_causal_mha_forward(x, prep, H)
    out = jax.block_until_ready(out)

    ref = reference_forward(x, params, perm, H)
    assert out.shape == (B, T, C)
    # Tolerance relaxed from 1e-4 -> 2e-3 for the EUP approx reciprocal.
    assert jnp.allclose(out, ref, atol=2e-3, rtol=2e-3), "mismatch vs reference"

    print("KERNEL_OK")
</pallas_src>

<mosaic_0001>
module attributes {stable_mosaic.version = 11 : i64} {
  func.func @_mha_fused_kernel(%arg0: i32, %arg1: memref<16x32xf32, #tpu.memory_space<vmem>>, %arg2: memref<4x32x8xf32, #tpu.memory_space<vmem>>, %arg3: memref<4x32x8xf32, #tpu.memory_space<vmem>>, %arg4: memref<4x32x8xf32, #tpu.memory_space<vmem>>, %arg5: memref<32x32xf32, #tpu.memory_space<vmem>>, %arg6: memref<1x32xf32, #tpu.memory_space<vmem>>, %arg7: memref<16x16xf32, #tpu.memory_space<vmem>>, %arg8: memref<16x32xf32, #tpu.memory_space<vmem>>) attributes {dimension_semantics = [#tpu.dimension_semantics<arbitrary>], iteration_bounds = array<i64: 1>, scalar_prefetch = 0 : i64, scratch_operands = 0 : i64, tpu.core_type = #tpu.core_type<tc>, window_params = [{pipeline_mode = #tpu.pipeline_mode<synchronous>, transform_indices = @transform_0, window_bounds = array<i64: 16, 32>}, {pipeline_mode = #tpu.pipeline_mode<synchronous>, transform_indices = @transform_1, window_bounds = array<i64: 4, 32, 8>}, {pipeline_mode = #tpu.pipeline_mode<synchronous>, transform_indices = @transform_2, window_bounds = array<i64: 4, 32, 8>}, {pipeline_mode = #tpu.pipeline_mode<synchronous>, transform_indices = @transform_3, window_bounds = array<i64: 4, 32, 8>}, {pipeline_mode = #tpu.pipeline_mode<synchronous>, transform_indices = @transform_4, window_bounds = array<i64: 32, 32>}, {pipeline_mode = #tpu.pipeline_mode<synchronous>, transform_indices = @transform_5, window_bounds = array<i64: 1, 32>}, {pipeline_mode = #tpu.pipeline_mode<synchronous>, transform_indices = @transform_6, window_bounds = array<i64: 16, 16>}, {pipeline_mode = #tpu.pipeline_mode<synchronous>, transform_indices = @transform_7, window_bounds = array<i64: 16, 32>}]} {
    %c0 = arith.constant 0 : index
    %c0_0 = arith.constant 0 : index
    %0 = vector.load %arg1[%c0, %c0_0] : memref<16x32xf32, #tpu.memory_space<vmem>>, vector<16x32xf32>
    %c0_1 = arith.constant 0 : index
    %c0_2 = arith.constant 0 : index
    %1 = vector.load %arg7[%c0_1, %c0_2] : memref<16x16xf32, #tpu.memory_space<vmem>>, vector<16x16xf32>
    %c0_3 = arith.constant 0 : index
    %c0_4 = arith.constant 0 : index
    %2 = vector.load %arg5[%c0_3, %c0_4] : memref<32x32xf32, #tpu.memory_space<vmem>>, vector<32x32xf32>
    %c0_5 = arith.constant 0 : index
    %c0_6 = arith.constant 0 : index
    %c0_7 = arith.constant 0 : index
    %3 = vector.load %arg2[%c0_5, %c0_6, %c0_7] : memref<4x32x8xf32, #tpu.memory_space<vmem>>, vector<1x32x8xf32>
    %4 = vector.shape_cast %3 : vector<1x32x8xf32> to vector<32x8xf32>
    %cst = arith.constant dense<0.000000e+00> : vector<16x8xf32>
    %5 = tpu.matmul %0, %4, %cst {dimension_numbers = #tpu.dot_dimension_numbers<[1], [0], [0], [1], [0, 0, 1, 1], [], []>} : vector<16x32xf32>, vector<32x8xf32>, vector<16x8xf32> -> vector<16x8xf32>
    %c0_8 = arith.constant 0 : index
    %c0_9 = arith.constant 0 : index
    %c0_10 = arith.constant 0 : index
    %6 = vector.load %arg3[%c0_8, %c0_9, %c0_10] : memref<4x32x8xf32, #tpu.memory_space<vmem>>, vector<1x32x8xf32>
    %7 = vector.shape_cast %6 : vector<1x32x8xf32> to vector<32x8xf32>
    %cst_11 = arith.constant dense<0.000000e+00> : vector<16x8xf32>
    %8 = tpu.matmul %0, %7, %cst_11 {dimension_numbers = #tpu.dot_dimension_numbers<[1], [0], [0], [1], [0, 0, 1, 1], [], []>} : vector<16x32xf32>, vector<32x8xf32>, vector<16x8xf32> -> vector<16x8xf32>
    %c0_12 = arith.constant 0 : index
    %c0_13 = arith.constant 0 : index
    %c0_14 = arith.constant 0 : index
    %9 = vector.load %arg4[%c0_12, %c0_13, %c0_14] : memref<4x32x8xf32, #tpu.memory_space<vmem>>, vector<1x32x8xf32>
    %10 = vector.shape_cast %9 : vector<1x32x8xf32> to vector<32x8xf32>
    %cst_15 = arith.constant dense<0.000000e+00> : vector<16x8xf32>
    %11 = tpu.matmul %0, %10, %cst_15 {dimension_numbers = #tpu.dot_dimension_numbers<[1], [0], [0], [1], [0, 0, 1, 1], [], []>} : vector<16x32xf32>, vector<32x8xf32>, vector<16x8xf32> -> vector<16x8xf32>
    "tpu.trace_start"() <{level = 10 : i32, message = "td,ud->tu"}> : () -> ()
    %cst_16 = arith.constant dense<0.000000e+00> : vector<16x16xf32>
    %12 = tpu.matmul %5, %8, %cst_16 {dimension_numbers = #tpu.dot_dimension_numbers<[1], [1], [0], [0], [0, 0, 1, 0], [], []>} : vector<16x8xf32>, vector<16x8xf32>, vector<16x16xf32> -> vector<16x16xf32>
    "tpu.trace_stop"() : () -> ()
    %13 = arith.addf %12, %1 : vector<16x16xf32>
    %cst_17 = arith.constant dense<0xFF800000> : vector<16xf32>
    %14 = vector.multi_reduction <maximumf>, %13, %cst_17 [1] : vector<16x16xf32> to vector<16xf32>
    %15 = vector.shape_cast %14 : vector<16xf32> to vector<16x1xf32>
    %16 = vector.broadcast %15 : vector<16x1xf32> to vector<16x16xf32>
    %17 = arith.subf %13, %16 : vector<16x16xf32>
    %18 = math.exp %17 : vector<16x16xf32>
    %cst_18 = arith.constant dense<0.000000e+00> : vector<16xf32>
    %19 = vector.multi_reduction <add>, %18, %cst_18 [1] : vector<16x16xf32> to vector<16xf32>
    %20 = vector.shape_cast %19 : vector<16xf32> to vector<16x1xf32>
    %21 = tpu.reciprocal %20 {approx = true} : vector<16x1xf32> -> vector<16x1xf32>
    %22 = vector.broadcast %21 : vector<16x1xf32> to vector<16x16xf32>
    %23 = arith.mulf %18, %22 : vector<16x16xf32>
    %cst_19 = arith.constant dense<0.000000e+00> : vector<16x8xf32>
    %24 = tpu.matmul %23, %11, %cst_19 {dimension_numbers = #tpu.dot_dimension_numbers<[1], [0], [0], [1], [0, 0, 1, 1], [], []>} : vector<16x16xf32>, vector<16x8xf32>, vector<16x8xf32> -> vector<16x8xf32>
    %25 = vector.extract_strided_slice %2 {offsets = [0, 0], sizes = [8, 32], strides = [1, 1]} : vector<32x32xf32> to vector<8x32xf32>
    %cst_20 = arith.constant dense<0.000000e+00> : vector<16x32xf32>
    %26 = tpu.matmul %24, %25, %cst_20 {dimension_numbers = #tpu.dot_dimension_numbers<[1], [0], [0], [1], [0, 0, 1, 1], [], []>} : vector<16x8xf32>, vector<8x32xf32>, vector<16x32xf32> -> vector<16x32xf32>
    %c1 = arith.constant 1 : index
    %c0_21 = arith.constant 0 : index
    %c0_22 = arith.constant 0 : index
    %27 = vector.load %arg2[%c1, %c0_21, %c0_22] : memref<4x32x8xf32, #tpu.memory_space<vmem>>, vector<1x32x8xf32>
    %28 = vector.shape_cast %27 : vector<1x32x8xf32> to vector<32x8xf32>
    %cst_23 = arith.constant dense<0.000000e+00> : vector<16x8xf32>
    %29 = tpu.matmul %0, %28, %cst_23 {dimension_numbers = #tpu.dot_dimension_numbers<[1], [0], [0], [1], [0, 0, 1, 1], [], []>} : vector<16x32xf32>, vector<32x8xf32>, vector<16x8xf32> -> vector<16x8xf32>
    %c1_24 = arith.constant 1 : index
    %c0_25 = arith.constant 0 : index
    %c0_26 = arith.constant 0 : index
    %30 = vector.load %arg3[%c1_24, %c0_25, %c0_26] : memref<4x32x8xf32, #tpu.memory_space<vmem>>, vector<1x32x8xf32>
    %31 = vector.shape_cast %30 : vector<1x32x8xf32> to vector<32x8xf32>
    %cst_27 = arith.constant dense<0.000000e+00> : vector<16x8xf32>
    %32 = tpu.matmul %0, %31, %cst_27 {dimension_numbers = #tpu.dot_dimension_numbers<[1], [0], [0], [1], [0, 0, 1, 1], [], []>} : vector<16x32xf32>, vector<32x8xf32>, vector<16x8xf32> -> vector<16x8xf32>
    %c1_28 = arith.constant 1 : index
    %c0_29 = arith.constant 0 : index
    %c0_30 = arith.constant 0 : index
    %33 = vector.load %arg4[%c1_28, %c0_29, %c0_30] : memref<4x32x8xf32, #tpu.memory_space<vmem>>, vector<1x32x8xf32>
    %34 = vector.shape_cast %33 : vector<1x32x8xf32> to vector<32x8xf32>
    %cst_31 = arith.constant dense<0.000000e+00> : vector<16x8xf32>
    %35 = tpu.matmul %0, %34, %cst_31 {dimension_numbers = #tpu.dot_dimension_numbers<[1], [0], [0], [1], [0, 0, 1, 1], [], []>} : vector<16x32xf32>, vector<32x8xf32>, vector<16x8xf32> -> vector<16x8xf32>
    "tpu.trace_start"() <{level = 10 : i32, message = "td,ud->tu"}> : () -> ()
    %cst_32 = arith.constant dense<0.000000e+00> : vector<16x16xf32>
    %36 = tpu.matmul %29, %32, %cst_32 {dimension_numbers = #tpu.dot_dimension_numbers<[1], [1], [0], [0], [0, 0, 1, 0], [], []>} : vector<16x8xf32>, vector<16x8xf32>, vector<16x16xf32> -> vector<16x16xf32>
    "tpu.trace_stop"() : () -> ()
    %37 = arith.addf %36, %1 : vector<16x16xf32>
    %cst_33 = arith.constant dense<0xFF800000> : vector<16xf32>
    %38 = vector.multi_reduction <maximumf>, %37, %cst_33 [1] : vector<16x16xf32> to vector<16xf32>
    %39 = vector.shape_cast %38 : vector<16xf32> to vector<16x1xf32>
    %40 = vector.broadcast %39 : vector<16x1xf32> to vector<16x16xf32>
    %41 = arith.subf %37, %40 : vector<16x16xf32>
    %42 = math.exp %41 : vector<16x16xf32>
    %cst_34 = arith.constant dense<0.000000e+00> : vector<16xf32>
    %43 = vector.multi_reduction <add>, %42, %cst_34 [1] : vector<16x16xf32> to vector<16xf32>
    %44 = vector.shape_cast %43 : vector<16xf32> to vector<16x1xf32>
    %45 = tpu.reciprocal %44 {approx = true} : vector<16x1xf32> -> vector<16x1xf32>
    %46 = vector.broadcast %45 : vector<16x1xf32> to vector<16x16xf32>
    %47 = arith.mulf %42, %46 : vector<16x16xf32>
    %cst_35 = arith.constant dense<0.000000e+00> : vector<16x8xf32>
    %48 = tpu.matmul %47, %35, %cst_35 {dimension_numbers = #tpu.dot_dimension_numbers<[1], [0], [0], [1], [0, 0, 1, 1], [], []>} : vector<16x16xf32>, vector<16x8xf32>, vector<16x8xf32> -> vector<16x8xf32>
    %49 = vector.extract_strided_slice %2 {offsets = [8, 0], sizes = [8, 32], strides = [1, 1]} : vector<32x32xf32> to vector<8x32xf32>
    %cst_36 = arith.constant dense<0.000000e+00> : vector<16x32xf32>
    %50 = tpu.matmul %48, %49, %cst_36 {dimension_numbers = #tpu.dot_dimension_numbers<[1], [0], [0], [1], [0, 0, 1, 1], [], []>} : vector<16x8xf32>, vector<8x32xf32>, vector<16x32xf32> -> vector<16x32xf32>
    %51 = arith.addf %26, %50 : vector<16x32xf32>
    %c2 = arith.constant 2 : index
    %c0_37 = arith.constant 0 : index
    %c0_38 = arith.constant 0 : index
    %52 = vector.load %arg2[%c2, %c0_37, %c0_38] : memref<4x32x8xf32, #tpu.memory_space<vmem>>, vector<1x32x8xf32>
    %53 = vector.shape_cast %52 : vector<1x32x8xf32> to vector<32x8xf32>
    %cst_39 = arith.constant dense<0.000000e+00> : vector<16x8xf32>
    %54 = tpu.matmul %0, %53, %cst_39 {dimension_numbers = #tpu.dot_dimension_numbers<[1], [0], [0], [1], [0, 0, 1, 1], [], []>} : vector<16x32xf32>, vector<32x8xf32>, vector<16x8xf32> -> vector<16x8xf32>
    %c2_40 = arith.constant 2 : index
    %c0_41 = arith.constant 0 : index
    %c0_42 = arith.constant 0 : index
    %55 = vector.load %arg3[%c2_40, %c0_41, %c0_42] : memref<4x32x8xf32, #tpu.memory_space<vmem>>, vector<1x32x8xf32>
    %56 = vector.shape_cast %55 : vector<1x32x8xf32> to vector<32x8xf32>
    %cst_43 = arith.constant dense<0.000000e+00> : vector<16x8xf32>
    %57 = tpu.matmul %0, %56, %cst_43 {dimension_numbers = #tpu.dot_dimension_numbers<[1], [0], [0], [1], [0, 0, 1, 1], [], []>} : vector<16x32xf32>, vector<32x8xf32>, vector<16x8xf32> -> vector<16x8xf32>
    %c2_44 = arith.constant 2 : index
    %c0_45 = arith.constant 0 : index
    %c0_46 = arith.constant 0 : index
    %58 = vector.load %arg4[%c2_44, %c0_45, %c0_46] : memref<4x32x8xf32, #tpu.memory_space<vmem>>, vector<1x32x8xf32>
    %59 = vector.shape_cast %58 : vector<1x32x8xf32> to vector<32x8xf32>
    %cst_47 = arith.constant dense<0.000000e+00> : vector<16x8xf32>
    %60 = tpu.matmul %0, %59, %cst_47 {dimension_numbers = #tpu.dot_dimension_numbers<[1], [0], [0], [1], [0, 0, 1, 1], [], []>} : vector<16x32xf32>, vector<32x8xf32>, vector<16x8xf32> -> vector<16x8xf32>
    "tpu.trace_start"() <{level = 10 : i32, message = "td,ud->tu"}> : () -> ()
    %cst_48 = arith.constant dense<0.000000e+00> : vector<16x16xf32>
    %61 = tpu.matmul %54, %57, %cst_48 {dimension_numbers = #tpu.dot_dimension_numbers<[1], [1], [0], [0], [0, 0, 1, 0], [], []>} : vector<16x8xf32>, vector<16x8xf32>, vector<16x16xf32> -> vector<16x16xf32>
    "tpu.trace_stop"() : () -> ()
    %62 = arith.addf %61, %1 : vector<16x16xf32>
    %cst_49 = arith.constant dense<0xFF800000> : vector<16xf32>
    %63 = vector.multi_reduction <maximumf>, %62, %cst_49 [1] : vector<16x16xf32> to vector<16xf32>
    %64 = vector.shape_cast %63 : vector<16xf32> to vector<16x1xf32>
    %65 = vector.broadcast %64 : vector<16x1xf32> to vector<16x16xf32>
    %66 = arith.subf %62, %65 : vector<16x16xf32>
    %67 = math.exp %66 : vector<16x16xf32>
    %cst_50 = arith.constant dense<0.000000e+00> : vector<16xf32>
    %68 = vector.multi_reduction <add>, %67, %cst_50 [1] : vector<16x16xf32> to vector<16xf32>
    %69 = vector.shape_cast %68 : vector<16xf32> to vector<16x1xf32>
    %70 = tpu.reciprocal %69 {approx = true} : vector<16x1xf32> -> vector<16x1xf32>
    %71 = vector.broadcast %70 : vector<16x1xf32> to vector<16x16xf32>
    %72 = arith.mulf %67, %71 : vector<16x16xf32>
    %cst_51 = arith.constant dense<0.000000e+00> : vector<16x8xf32>
    %73 = tpu.matmul %72, %60, %cst_51 {dimension_numbers = #tpu.dot_dimension_numbers<[1], [0], [0], [1], [0, 0, 1, 1], [], []>} : vector<16x16xf32>, vector<16x8xf32>, vector<16x8xf32> -> vector<16x8xf32>
    %74 = vector.extract_strided_slice %2 {offsets = [16, 0], sizes = [8, 32], strides = [1, 1]} : vector<32x32xf32> to vector<8x32xf32>
    %cst_52 = arith.constant dense<0.000000e+00> : vector<16x32xf32>
    %75 = tpu.matmul %73, %74, %cst_52 {dimension_numbers = #tpu.dot_dimension_numbers<[1], [0], [0], [1], [0, 0, 1, 1], [], []>} : vector<16x8xf32>, vector<8x32xf32>, vector<16x32xf32> -> vector<16x32xf32>
    %76 = arith.addf %51, %75 : vector<16x32xf32>
    %c3 = arith.constant 3 : index
    %c0_53 = arith.constant 0 : index
    %c0_54 = arith.constant 0 : index
    %77 = vector.load %arg2[%c3, %c0_53, %c0_54] : memref<4x32x8xf32, #tpu.memory_space<vmem>>, vector<1x32x8xf32>
    %78 = vector.shape_cast %77 : vector<1x32x8xf32> to vector<32x8xf32>
    %cst_55 = arith.constant dense<0.000000e+00> : vector<16x8xf32>
    %79 = tpu.matmul %0, %78, %cst_55 {dimension_numbers = #tpu.dot_dimension_numbers<[1], [0], [0], [1], [0, 0, 1, 1], [], []>} : vector<16x32xf32>, vector<32x8xf32>, vector<16x8xf32> -> vector<16x8xf32>
    %c3_56 = arith.constant 3 : index
    %c0_57 = arith.constant 0 : index
    %c0_58 = arith.constant 0 : index
    %80 = vector.load %arg3[%c3_56, %c0_57, %c0_58] : memref<4x32x8xf32, #tpu.memory_space<vmem>>, vector<1x32x8xf32>
    %81 = vector.shape_cast %80 : vector<1x32x8xf32> to vector<32x8xf32>
    %cst_59 = arith.constant dense<0.000000e+00> : vector<16x8xf32>
    %82 = tpu.matmul %0, %81, %cst_59 {dimension_numbers = #tpu.dot_dimension_numbers<[1], [0], [0], [1], [0, 0, 1, 1], [], []>} : vector<16x32xf32>, vector<32x8xf32>, vector<16x8xf32> -> vector<16x8xf32>
    %c3_60 = arith.constant 3 : index
    %c0_61 = arith.constant 0 : index
    %c0_62 = arith.constant 0 : index
    %83 = vector.load %arg4[%c3_60, %c0_61, %c0_62] : memref<4x32x8xf32, #tpu.memory_space<vmem>>, vector<1x32x8xf32>
    %84 = vector.shape_cast %83 : vector<1x32x8xf32> to vector<32x8xf32>
    %cst_63 = arith.constant dense<0.000000e+00> : vector<16x8xf32>
    %85 = tpu.matmul %0, %84, %cst_63 {dimension_numbers = #tpu.dot_dimension_numbers<[1], [0], [0], [1], [0, 0, 1, 1], [], []>} : vector<16x32xf32>, vector<32x8xf32>, vector<16x8xf32> -> vector<16x8xf32>
    "tpu.trace_start"() <{level = 10 : i32, message = "td,ud->tu"}> : () -> ()
    %cst_64 = arith.constant dense<0.000000e+00> : vector<16x16xf32>
    %86 = tpu.matmul %79, %82, %cst_64 {dimension_numbers = #tpu.dot_dimension_numbers<[1], [1], [0], [0], [0, 0, 1, 0], [], []>} : vector<16x8xf32>, vector<16x8xf32>, vector<16x16xf32> -> vector<16x16xf32>
    "tpu.trace_stop"() : () -> ()
    %87 = arith.addf %86, %1 : vector<16x16xf32>
    %cst_65 = arith.constant dense<0xFF800000> : vector<16xf32>
    %88 = vector.multi_reduction <maximumf>, %87, %cst_65 [1] : vector<16x16xf32> to vector<16xf32>
    %89 = vector.shape_cast %88 : vector<16xf32> to vector<16x1xf32>
    %90 = vector.broadcast %89 : vector<16x1xf32> to vector<16x16xf32>
    %91 = arith.subf %87, %90 : vector<16x16xf32>
    %92 = math.exp %91 : vector<16x16xf32>
    %cst_66 = arith.constant dense<0.000000e+00> : vector<16xf32>
    %93 = vector.multi_reduction <add>, %92, %cst_66 [1] : vector<16x16xf32> to vector<16xf32>
    %94 = vector.shape_cast %93 : vector<16xf32> to vector<16x1xf32>
    %95 = tpu.reciprocal %94 {approx = true} : vector<16x1xf32> -> vector<16x1xf32>
    %96 = vector.broadcast %95 : vector<16x1xf32> to vector<16x16xf32>
    %97 = arith.mulf %92, %96 : vector<16x16xf32>
    %cst_67 = arith.constant dense<0.000000e+00> : vector<16x8xf32>
    %98 = tpu.matmul %97, %85, %cst_67 {dimension_numbers = #tpu.dot_dimension_numbers<[1], [0], [0], [1], [0, 0, 1, 1], [], []>} : vector<16x16xf32>, vector<16x8xf32>, vector<16x8xf32> -> vector<16x8xf32>
    %99 = vector.extract_strided_slice %2 {offsets = [24, 0], sizes = [8, 32], strides = [1, 1]} : vector<32x32xf32> to vector<8x32xf32>
    %cst_68 = arith.constant dense<0.000000e+00> : vector<16x32xf32>
    %100 = tpu.matmul %98, %99, %cst_68 {dimension_numbers = #tpu.dot_dimension_numbers<[1], [0], [0], [1], [0, 0, 1, 1], [], []>} : vector<16x8xf32>, vector<8x32xf32>, vector<16x32xf32> -> vector<16x32xf32>
    %101 = arith.addf %76, %100 : vector<16x32xf32>
    %c0_69 = arith.constant 0 : index
    %c0_70 = arith.constant 0 : index
    %102 = vector.load %arg6[%c0_69, %c0_70] : memref<1x32xf32, #tpu.memory_space<vmem>>, vector<1x32xf32>
    %103 = vector.broadcast %102 : vector<1x32xf32> to vector<16x32xf32>
    %104 = arith.addf %101, %103 : vector<16x32xf32>
    %c0_71 = arith.constant 0 : index
    %c0_72 = arith.constant 0 : index
    %105 = vector.load %arg8[%c0_71, %c0_72] : memref<16x32xf32, #tpu.memory_space<vmem>>, vector<16x32xf32>
    tpu.vector_store %arg8[%c0_71, %c0_72], %104 {strides = array<i32>} : memref<16x32xf32, #tpu.memory_space<vmem>>, vector<16x32xf32>,
    return
  }
  func.func @transform_0(%arg0: i32) -> (i32, i32) {
    %c0_i32 = arith.constant 0 : i32
    %c0_i32_0 = arith.constant 0 : i32
    %c0_i32_1 = arith.constant 0 : i32
    return %c0_i32, %c0_i32_0 : i32, i32
  }
  func.func @transform_1(%arg0: i32) -> (i32, i32, i32) {
    %c0_i32 = arith.constant 0 : i32
    %c0_i32_0 = arith.constant 0 : i32
    %c0_i32_1 = arith.constant 0 : i32
    %c0_i32_2 = arith.constant 0 : i32
    return %c0_i32, %c0_i32_0, %c0_i32_1 : i32, i32, i32
  }
  func.func @transform_2(%arg0: i32) -> (i32, i32, i32) {
    %c0_i32 = arith.constant 0 : i32
    %c0_i32_0 = arith.constant 0 : i32
    %c0_i32_1 = arith.constant 0 : i32
    %c0_i32_2 = arith.constant 0 : i32
    return %c0_i32, %c0_i32_0, %c0_i32_1 : i32, i32, i32
  }
  func.func @transform_3(%arg0: i32) -> (i32, i32, i32) {
    %c0_i32 = arith.constant 0 : i32
    %c0_i32_0 = arith.constant 0 : i32
    %c0_i32_1 = arith.constant 0 : i32
    %c0_i32_2 = arith.constant 0 : i32
    return %c0_i32, %c0_i32_0, %c0_i32_1 : i32, i32, i32
  }
  func.func @transform_4(%arg0: i32) -> (i32, i32) {
    %c0_i32 = arith.constant 0 : i32
    %c0_i32_0 = arith.constant 0 : i32
    %c0_i32_1 = arith.constant 0 : i32
    return %c0_i32, %c0_i32_0 : i32, i32
  }
  func.func @transform_5(%arg0: i32) -> (i32, i32) {
    %c0_i32 = arith.constant 0 : i32
    %c0_i32_0 = arith.constant 0 : i32
    %c0_i32_1 = arith.constant 0 : i32
    return %c0_i32, %c0_i32_0 : i32, i32
  }
  func.func @transform_6(%arg0: i32) -> (i32, i32) {
    %c0_i32 = arith.constant 0 : i32
    %c0_i32_0 = arith.constant 0 : i32
    %c0_i32_1 = arith.constant 0 : i32
    return %c0_i32, %c0_i32_0 : i32, i32
  }
  func.func @transform_7(%arg0: i32) -> (i32, i32) {
    %c0_i32 = arith.constant 0 : i32
    %c0_i32_0 = arith.constant 0 : i32
    %c0_i32_1 = arith.constant 0 : i32
    return %c0_i32, %c0_i32_0 : i32, i32
  }
}

</mosaic_0001>

<bundles_post_ra>
// kernel: tpu_custom_call.1
= control target key start
LH: loop header
LB: loop body
LE: loop exit
PB: predicated region body
PF: predicated region fallthrough
CT: control target
= control target key end

     0   :  { %s1364_s0 = inlined_call_operand.vmem [shape: f32[16,32], index: 0, kind: input, shape index: {}]   ;;  %s1365_s1 = inlined_call_operand.vmem [shape: f32[4,32,8], index: 1, kind: input, shape index: {}]   ;;  %s1366_s2 = inlined_call_operand.vmem [shape: f32[4,32,8], index: 2, kind: input, shape index: {}]   ;;  %s1367_s3 = inlined_call_operand.vmem [shape: f32[4,32,8], index: 3, kind: input, shape index: {}]   ;;  %s1368_s4 = inlined_call_operand.vmem [shape: f32[32,32], index: 4, kind: input, shape index: {}]   ;;  %s1369_s5 = inlined_call_operand.vmem [shape: f32[1,32], index: 5, kind: input, shape index: {}]   ;;  %s1370_s6 = inlined_call_operand.vmem [shape: f32[16,16], index: 6, kind: input, shape index: {}]   ;;  %s1371_s7 = inlined_call_operand.hbm [shape: f32[16,32], index: 7, kind: output, shape index: {}]  }
   0x1   :  { %v72_v0 = vld [vmem:[%s1366_s2 + $0x18] sm:$0xff]  ;;  %v71_v1 = vld [vmem:[%s1366_s2 + $0x10] sm:$0xff]  ;;  %v70_v3 = vld [vmem:[%s1366_s2 + $0x8] sm:$0xff] }
   0x2   :  { %85 = vmatpush.msra.mxu1 %v72_v0  ;;  %v38_v2 = vld [vmem:[%s1365_s1 + $0x18] sm:$0xff]  ;;  %v37_v4 = vld [vmem:[%s1365_s1 + $0x10] sm:$0xff]  ;;  %v36_v5 = vld [vmem:[%s1365_s1 + $0x8] sm:$0xff] }
   0x3   :  { %58 = vmatpush.msra.mxu0 %v38_v2 }
   0x4   :  { %86 = vmatpush.msra.mxu1 %v71_v1 }
   0x5   :  { %12 = vsyncpa [#allocation3], 0  ;;  %v69_v6 = vld [vmem:[%s1366_s2] sm:$0xff]  ;;  %59 = vmatpush.msra.mxu0 %v37_v4  ;;  %vm39_vm0 = vcmask 261120   ;;  %v1100_v9 = vld [vmem:[%s1364_s0 + $0x8] sm:$0xff]  ;;  %vm123_vm1 = vcmask 64512  }
   0x6   :  { %87 = vmatpush.msra.mxu1 %v70_v3  ;;  %v1088_v7 = vld [vmem:[%s1364_s0] sm:$0xff]  ;;  %v99_v14 = vld [vmem:[%s1367_s3 + $0x18] sm:$0xff]  ;;  %v98_v15 = vld [vmem:[%s1367_s3 + $0x10] sm:$0xff]  ;;  %vm159_vm2 = vcmask 130048   ;;  %s1021_s12 = smov [#allocation2]   ;;  %s855_s16 = sshll.u32 %s1371_s7, 4  ;;  %s856_s16 = int_to_ptr.hbm [resolvable:$true] %s855_s16 }
   0x7   :  { %v35_v8 = vld [vmem:[%s1365_s1] sm:$0xff]  ;;  %60 = vmatpush.msra.mxu0 %v36_v5  ;;  %112 = vmatpush.msra.mxu2 %v99_v14  ;;  %v97_v16 = vld [vmem:[%s1367_s3 + $0x8] sm:$0xff]  ;;  %v888_v18 = vld [vmem:[%s1366_s2 + $0x38] sm:$0xff]  ;;  %s853_s13 = sshll.u32 %s1021_s12, 4  ;;  %s1022_s17 = smov 128   ;;  %s854_s13 = int_to_ptr.vmem [resolvable:$true] %s853_s13 }
   0x8   :  { %88 = vmatpush.msra.mxu1 %v69_v6  ;;  %v96_v17 = vld [vmem:[%s1367_s3] sm:$0xff]  ;;  %v887_v19 = vld [vmem:[%s1366_s2 + $0x30] sm:$0xff]  ;;  %v886_v20 = vld [vmem:[%s1366_s2 + $0x28] sm:$0xff] }
   0x9   :  { %869 = vmatmul.msk.f32.vlgmr.msra.gmra.mxu1 %vm39_vm0, %v1088_v7  ;;  %61 = vmatpush.msra.mxu0 %v35_v8  ;;  %v885_v21 = vld [vmem:[%s1366_s2 + $0x20] sm:$0xff]  ;;  %v1150_v26 = vld [vmem:[%s1370_s6 + $0x8] sm:$0xff]  ;;  %v882_v30 = vld [vmem:[%s1365_s1 + $0x38] sm:$0xff] }
   0xa   :  { %867 = vmatmul.msk.f32.vlgmr.msra.gmra.mxu0 %vm39_vm0, %v1088_v7  ;;  %113 = vmatpush.msra.mxu2 %v98_v15  ;;  %v1141_v22 = vld [vmem:[%s1370_s6] sm:$0xff]  ;;  %v881_v31 = vld [vmem:[%s1365_s1 + $0x30] sm:$0xff]  ;;  %v880_v32 = vld [vmem:[%s1365_s1 + $0x28] sm:$0xff] }
   0xb   :  { %228 = vmatpush.msrb.mxu1 %v882_v30  ;;  %v879_v33 = vld [vmem:[%s1365_s1 + $0x20] sm:$0xff]  ;;  %v894_v49 = vld [vmem:[%s1367_s3 + $0x38] sm:$0xff]  ;;  %v893_v50 = vld [vmem:[%s1367_s3 + $0x30] sm:$0xff] }
   0xc   :  { %114 = vmatpush.msra.mxu2 %v97_v16  ;;  %v892_v51 = vld [vmem:[%s1367_s3 + $0x28] sm:$0xff]  ;;  %v891_v52 = vld [vmem:[%s1367_s3 + $0x20] sm:$0xff] }
   0xd   :  { %229 = vmatpush.msrb.mxu1 %v881_v31  ;;  %v31_v60 = vld [vmem:[%s1368_s4] sm:$0xff] }
   0xe   :  { %115 = vmatpush.msra.mxu2 %v96_v17 }
   0xf   :  { %871 = vmatmul.msk.f32.vlgmr.msra.gmra.mxu2 %vm39_vm0, %v1088_v7  ;;  %230 = vmatpush.msrb.mxu1 %v880_v32 }
  0x10   :  { %256 = vmatpush.msrb.mxu2 %v888_v18 }
  0x11   :  { %870 = vmatmul.msk.f32.gmra.mxu1 %vm39_vm0, %v1100_v9 }
  0x12   :  { %868 = vmatmul.msk.f32.gmra.mxu0 %vm39_vm0, %v1100_v9  ;;  %257 = vmatpush.msrb.mxu2 %v887_v19  ;;  %v916_v19 = vld [vmem:[%s1366_s2 + $0x58] sm:$0xff] }
  0x13   :  { %231 = vmatpush.msrb.mxu1 %v879_v33 }
  0x14   :  { %258 = vmatpush.msrb.mxu2 %v886_v20  ;;  %v915_v20 = vld [vmem:[%s1366_s2 + $0x50] sm:$0xff] }
  0x16   :  { %259 = vmatpush.msrb.mxu2 %v885_v21  ;;  %v914_v21 = vld [vmem:[%s1366_s2 + $0x48] sm:$0xff] }
  0x17   :  { %872 = vmatmul.msk.f32.gmra.mxu2 %vm39_vm0, %v1100_v9 }
  0x19   :  { %883 = vmatmul.msk.f32.vlgmr.msrb.gmra.mxu1 %vm39_vm0, %v1088_v7 }
  0x1f   :  { %889 = vmatmul.msk.f32.vlgmr.msrb.gmra.mxu2 %vm39_vm0, %v1088_v7 }
  0x21   :  { %884 = vmatmul.msk.f32.gmra.mxu1 %vm39_vm0, %v1100_v9 }
  0x27   :  { %890 = vmatmul.msk.f32.gmra.mxu2 %vm39_vm0, %v1100_v9 }
  0x86   :  { %v90_v10 = vpop.f32.mrf.mxu1 }
  0x87   :  { %v63_v12 = vpop.f32.mrf.mxu0 }
  0x8e   :  { %v93_v11 = vpop.f32.mrf.mxu1 }
  0x8f   :  { %873 = vmatpush.xpose.msk.msra.mxu3 %vm123_vm1, %v93_v11  ;;  %v66_v13 = vpop.f32.mrf.mxu0 }
  0x92   :  { %v117_v35 = vpop.f32.mrf.mxu2 }
  0x93   :  { %874 = vmatpush.xpose.msk.msra.mxu3 %vm123_vm1, %v90_v10 }
  0x96   :  { %875 = vmatmul.msk.f32.vlgmr.msra.gmra.mxu3 %vm123_vm1, %v63_v12  ;;  %v233_v58 = vpop.f32.mrf.mxu1 }
  0x97   :  { %284 = vmatpush.msrb.mxu3 %v894_v49 }
  0x99   :  { %285 = vmatpush.msrb.mxu3 %v893_v50 }
  0x9a   :  { %v120_v39 = vpop.f32.mrf.mxu2 }
  0x9b   :  { %202 = vmatpush.msrb.mxu0 %v120_v39  ;;  %286 = vmatpush.msrb.mxu3 %v892_v51 }
  0x9d   :  { %203 = vmatpush.msrb.mxu0 %v117_v35  ;;  %287 = vmatpush.msrb.mxu3 %v891_v52  ;;  %v32_v35 = vld [vmem:[%s1368_s4 + $0x8] sm:$0xff] }
  0x9e   :  { %876 = vmatmul.msk.f32.gmra.mxu3 %vm123_vm1, %v66_v13  ;;  %v236_v59 = vpop.f32.mrf.mxu1  ;;  %402 = vmatpush.msra.mxu2 %v32_v35 }
  0x9f   :  { %431 = vmatpush.msra.mxu3 %v31_v60 }
  0xa2   :  { %v261_v46 = vpop.f32.mrf.mxu2 }
  0xa6   :  { %895 = vmatmul.msk.f32.vlgmr.msrb.gmra.mxu3 %vm39_vm0, %v1088_v7 }
  0xaa   :  { %v264_v47 = vpop.f32.mrf.mxu2 }
  0xab   :  { %897 = vmatpush.xpose.msk.msra.mxu0 %vm123_vm1, %v264_v47 }
  0xae   :  { %896 = vmatmul.msk.f32.gmra.mxu3 %vm39_vm0, %v1100_v9 }
  0xaf   :  { %898 = vmatpush.xpose.msk.msra.mxu0 %vm123_vm1, %v261_v46  ;;  %v919_v46 = vld [vmem:[%s1367_s3 + $0x40] sm:$0xff] }
 0x119   :  { %v153_v23 = vpop.f32.mrf.mxu3 }
 0x11a   :  { %v154_v24 = vadd.f32 %v153_v23, %v1141_v22  ;;  %v913_v23 = vld [vmem:[%s1366_s2 + $0x40] sm:$0xff] }
 0x11c   :  { %v160_v25 = vsel %vm159_vm2, %v154_v24, -inf }
 0x11d   :  { %161 = vmax.xlane.f32.xlu0 %v160_v25 }
 0x121   :  { %v156_v27 = vpop.f32.mrf.mxu3 }
 0x122   :  { %v157_v28 = vadd.f32 %v156_v27, %v1150_v26  ;;  %v909_v27 = vld [vmem:[%s1365_s1 + $0x50] sm:$0xff] }
 0x124   :  { %v163_v29 = vsel %vm159_vm2, %v157_v28, -inf }
 0x125   :  { %164 = vmax.xlane.f32.xlu0 %v163_v29  ;;  %v907_v29 = vld [vmem:[%s1365_s1 + $0x40] sm:$0xff] }
 0x129   :  { %v289_v62 = vpop.f32.mrf.mxu3 }
 0x131   :  { %v292_v0 = vpop.f32.mrf.mxu3 }
 0x132   :  { %372 = vmatpush.msra.mxu1 %v292_v0 }
 0x134   :  { %373 = vmatpush.msra.mxu1 %v289_v62 }
 0x136   :  { %484 = vmatpush.msrb.mxu1 %v916_v19 }
 0x138   :  { %485 = vmatpush.msrb.mxu1 %v915_v20 }
 0x13a   :  { %486 = vmatpush.msrb.mxu1 %v914_v21 }
 0x13c   :  { %487 = vmatpush.msrb.mxu1 %v913_v23 }
 0x190   :  { %v162_v34 = vpop.xlane.xlu0 %161 }
 0x191   :  { %v166_v36 = vsub.f32 %v154_v24, %v162_v34  ;;  %v910_v24 = vld [vmem:[%s1365_s1 + $0x58] sm:$0xff] }
 0x193   :  { %v168_v37 = vmul.f32 1.442695, %v166_v36 }
 0x195   :  { %963 = vpow2.f32 %v168_v37 }
 0x198   :  { %v165_v38 = vpop.xlane.xlu0 %164 }
 0x199   :  { %v167_v40 = vsub.f32 %v157_v28, %v165_v38  ;;  %v908_v28 = vld [vmem:[%s1365_s1 + $0x48] sm:$0xff] }
 0x19b   :  { %v964_v41 = vpop.eup %963  ;;  %v170_v42 = vmul.f32 1.442695, %v167_v40 }
 0x19c   :  { %v172_v43 = vsel %vm159_vm2, %v964_v41, 0.0 }
 0x19d   :  { %965 = vpow2.f32 %v170_v42  ;;  %173 = vadd.xlane.f32.xlu1 %v172_v43  ;;  %v922_v42 = vld [vmem:[%s1367_s3 + $0x58] sm:$0xff]  ;;  %v921_v43 = vld [vmem:[%s1367_s3 + $0x50] sm:$0xff] }
 0x19e   :  { %512 = vmatpush.msrb.mxu2 %v922_v42 }
 0x1a0   :  { %513 = vmatpush.msrb.mxu2 %v921_v43 }
 0x1a3   :  { %v966_v44 = vpop.eup %965 }
 0x1a4   :  { %v175_v45 = vsel %vm159_vm2, %v966_v44, 0.0 }
 0x1a5   :  { %176 = vadd.xlane.f32.xlu1 %v175_v45  ;;  %v920_v45 = vld [vmem:[%s1367_s3 + $0x48] sm:$0xff] }
 0x1a6   :  { %514 = vmatpush.msrb.mxu2 %v920_v45 }
 0x1a8   :  { %515 = vmatpush.msrb.mxu2 %v919_v46 }
 0x210   :  { %v174_v48 = vpop.xlane.xlu1 %173 }
 0x211   :  { %967 = vrcp.f32 %v174_v48 }
 0x217   :  { %v968_v53 = vpop.eup %967 }
 0x218   :  { %v177_v54 = vpop.xlane.xlu1 %176  ;;  %v180_v55 = vmul.f32 %v968_v53, %v964_v41 }
 0x219   :  { %969 = vrcp.f32 %v177_v54 }
 0x21a   :  { %877 = vmatmul.msk.f32.vlgmr.msrb.gmra.mxu0 %vm159_vm2, %v180_v55  ;;  %v942_v55 = vld [vmem:[%s1366_s2 + $0x78] sm:$0xff] }
 0x21b   :  { %456 = vmatpush.msrb.mxu0 %v910_v24 }
 0x21d   :  { %457 = vmatpush.msrb.mxu0 %v909_v27 }
 0x21f   :  { %v970_v56 = vpop.eup %969  ;;  %458 = vmatpush.msrb.mxu0 %v908_v28 }
 0x220   :  { %v181_v57 = vmul.f32 %v970_v56, %v966_v44  ;;  %v941_v56 = vld [vmem:[%s1366_s2 + $0x70] sm:$0xff] }
 0x221   :  { %459 = vmatpush.msrb.mxu0 %v907_v29  ;;  %v948_v29 = vld [vmem:[%s1367_s3 + $0x78] sm:$0xff] }
 0x222   :  { %878 = vmatmul.msk.f32.gmra.mxu0 %vm159_vm2, %v181_v57  ;;  %v940_v57 = vld [vmem:[%s1366_s2 + $0x68] sm:$0xff] }
 0x22a   :  { %899 = vmatmul.msk.f32.vlgmr.msra.gmra.mxu0 %vm123_vm1, %v233_v58 }
 0x232   :  { %900 = vmatmul.msk.f32.gmra.mxu0 %vm123_vm1, %v236_v59  ;;  %v939_v59 = vld [vmem:[%s1366_s2 + $0x60] sm:$0xff] }
 0x23a   :  { %911 = vmatmul.msk.f32.vlgmr.msrb.gmra.mxu0 %vm39_vm0, %v1088_v7 }
 0x242   :  { %912 = vmatmul.msk.f32.gmra.mxu0 %vm39_vm0, %v1100_v9 }
 0x297   :  { %v205_v61 = vpop.f32.mrf.mxu0 }
 0x298   :  { %905 = vmatmul.msk.f32.vlgmr.msra.gmra.mxu3 %vm123_vm1, %v205_v61 }
 0x29f   :  { %v208_v63 = vpop.f32.mrf.mxu0 }
 0x2a0   :  { %906 = vmatmul.msk.f32.gmra.mxu3 %vm123_vm1, %v208_v63 }
 0x2a7   :  { %v324_v1 = vpop.f32.mrf.mxu0 }
 0x2a8   :  { %v325_v2 = vadd.f32 %v324_v1, %v1141_v22 }
 0x2aa   :  { %v330_v3 = vsel %vm159_vm2, %v325_v2, -inf }
 0x2ab   :  { %331 = vmax.xlane.f32.xlu2 %v330_v3 }
 0x2af   :  { %v327_v4 = vpop.f32.mrf.mxu0 }
 0x2b0   :  { %v328_v5 = vadd.f32 %v327_v4, %v1150_v26 }
 0x2b2   :  { %v333_v6 = vsel %vm159_vm2, %v328_v5, -inf }
 0x2b3   :  { %334 = vmax.xlane.f32.xlu2 %v333_v6 }
 0x2b7   :  { %v461_v40 = vpop.f32.mrf.mxu0 }
 0x2bf   :  { %v464_v41 = vpop.f32.mrf.mxu0 }
 0x31b   :  { %v1256_v44 = vpop.f32.mrf.mxu3 }
 0x31e   :  { %v332_v8 = vpop.xlane.xlu2 %331 }
 0x31f   :  { %v336_v10 = vsub.f32 %v325_v2, %v332_v8 }
 0x321   :  { %v338_v11 = vmul.f32 1.442695, %v336_v10  ;;  %v936_v10 = vld [vmem:[%s1365_s1 + $0x78] sm:$0xff] }
 0x323   :  { %971 = vpow2.f32 %v338_v11  ;;  %v1266_v47 = vpop.f32.mrf.mxu3  ;;  %v935_v11 = vld [vmem:[%s1365_s1 + $0x70] sm:$0xff] }
 0x326   :  { %v335_v12 = vpop.xlane.xlu2 %334 }
 0x327   :  { %v337_v13 = vsub.f32 %v328_v5, %v335_v12  ;;  %v934_v12 = vld [vmem:[%s1365_s1 + $0x68] sm:$0xff] }
 0x329   :  { %v972_v14 = vpop.eup %971  ;;  %v340_v15 = vmul.f32 1.442695, %v337_v13  ;;  %v933_v13 = vld [vmem:[%s1365_s1 + $0x60] sm:$0xff] }
 0x32a   :  { %v342_v16 = vsel %vm159_vm2, %v972_v14, 0.0 }
 0x32b   :  { %973 = vpow2.f32 %v340_v15  ;;  %343 = vadd.xlane.f32.xlu0 %v342_v16 }
 0x331   :  { %v974_v17 = vpop.eup %973 }
 0x332   :  { %v345_v18 = vsel %vm159_vm2, %v974_v17, 0.0 }
 0x333   :  { %346 = vadd.xlane.f32.xlu1 %v345_v18 }
 0x39e   :  { %v344_v25 = vpop.xlane.xlu0 %343 }
 0x39f   :  { %975 = vrcp.f32 %v344_v25 }
 0x3a5   :  { %v976_v30 = vpop.eup %975 }
 0x3a6   :  { %v350_v31 = vmul.f32 %v976_v30, %v972_v14  ;;  %v347_v32 = vpop.xlane.xlu1 %346  ;;  %v33_v14 = vld [vmem:[%s1368_s4 + $0x10] sm:$0xff] }
 0x3a7   :  { %977 = vrcp.f32 %v347_v32  ;;  %v947_v30 = vld [vmem:[%s1367_s3 + $0x70] sm:$0xff] }
 0x3a8   :  { %901 = vmatmul.msk.f32.vlgmr.msra.gmra.mxu1 %vm159_vm2, %v350_v31  ;;  %v946_v31 = vld [vmem:[%s1367_s3 + $0x68] sm:$0xff] }
 0x3a9   :  { %630 = vmatpush.msra.mxu1 %v33_v14 }
 0x3ad   :  { %v978_v33 = vpop.eup %977 }
 0x3ae   :  { %v351_v34 = vmul.f32 %v978_v33, %v974_v17 }
 0x3b0   :  { %902 = vmatmul.msk.f32.gmra.mxu1 %vm159_vm2, %v351_v34  ;;  %v945_v34 = vld [vmem:[%s1367_s3 + $0x60] sm:$0xff] }
 0x3b8   :  { %917 = vmatmul.msk.f32.vlgmr.msrb.gmra.mxu1 %vm39_vm0, %v1088_v7 }
 0x3c0   :  { %918 = vmatmul.msk.f32.gmra.mxu1 %vm39_vm0, %v1100_v9 }
 0x425   :  { %v375_v36 = vpop.f32.mrf.mxu1 }
 0x426   :  { %903 = vmatmul.msk.f32.vlgmr.msra.gmra.mxu2 %vm123_vm1, %v375_v36 }
 0x427   :  { %657 = vmatpush.msra.mxu2 %v936_v10 }
 0x429   :  { %658 = vmatpush.msra.mxu2 %v935_v11 }
 0x42b   :  { %659 = vmatpush.msra.mxu2 %v934_v12 }
 0x42d   :  { %v378_v37 = vpop.f32.mrf.mxu1  ;;  %660 = vmatpush.msra.mxu2 %v933_v13 }
 0x42e   :  { %904 = vmatmul.msk.f32.gmra.mxu2 %vm123_vm1, %v378_v37 }
 0x435   :  { %v489_v38 = vpop.f32.mrf.mxu1 }
 0x436   :  { %923 = vmatmul.msk.f32.vlgmr.msrb.gmra.mxu2 %vm39_vm0, %v1088_v7 }
 0x43d   :  { %v492_v39 = vpop.f32.mrf.mxu1 }
 0x43e   :  { %925 = vmatpush.xpose.msk.msrb.mxu3 %vm123_vm1, %v492_v39  ;;  %924 = vmatmul.msk.f32.gmra.mxu2 %vm39_vm0, %v1100_v9 }
 0x442   :  { %926 = vmatpush.xpose.msk.msrb.mxu3 %vm123_vm1, %v489_v38 }
 0x445   :  { %927 = vmatmul.msk.f32.vlgmr.msrb.gmra.mxu3 %vm123_vm1, %v461_v40 }
 0x446   :  { %685 = vmatpush.msra.mxu3 %v942_v55  ;;  %937 = vmatmul.msk.f32.vlgmr.msra.gmra.mxu2 %vm39_vm0, %v1088_v7 }
 0x448   :  { %686 = vmatpush.msra.mxu3 %v941_v56 }
 0x44a   :  { %687 = vmatpush.msra.mxu3 %v940_v57 }
 0x44c   :  { %688 = vmatpush.msra.mxu3 %v939_v59 }
 0x44d   :  { %928 = vmatmul.msk.f32.gmra.mxu3 %vm123_vm1, %v464_v41 }
 0x44e   :  { %938 = vmatmul.msk.f32.gmra.mxu2 %vm39_vm0, %v1100_v9 }
 0x455   :  { %943 = vmatmul.msk.f32.vlgmr.msra.gmra.mxu3 %vm39_vm0, %v1088_v7 }
 0x45d   :  { %944 = vmatmul.msk.f32.gmra.mxu3 %vm39_vm0, %v1100_v9 }
 0x4a9   :  { %v1274_v54 = vpop.f32.mrf.mxu2 }
 0x4aa   :  { %v434_v32 = vadd.f32 %v1256_v44, %v1274_v54 }
 0x4b1   :  { %v1285_v58 = vpop.f32.mrf.mxu2 }
 0x4b2   :  { %v437_v36 = vadd.f32 %v1266_v47, %v1285_v58 }
 0x4b9   :  { %v517_v61 = vpop.f32.mrf.mxu2 }
 0x4c1   :  { %v520_v1 = vpop.f32.mrf.mxu2 }
 0x4c2   :  { %600 = vmatpush.msra.mxu0 %v520_v1 }
 0x4c4   :  { %601 = vmatpush.msra.mxu0 %v517_v61 }
 0x4c6   :  { %713 = vmatpush.msrb.mxu0 %v948_v29 }
 0x4c8   :  { %v552_v48 = vpop.f32.mrf.mxu3  ;;  %714 = vmatpush.msrb.mxu0 %v947_v30 }
 0x4c9   :  { %v553_v49 = vadd.f32 %v552_v48, %v1141_v22  ;;  %v662_v27 = vpop.f32.mrf.mxu2 }
 0x4ca   :  { %715 = vmatpush.msrb.mxu0 %v946_v31 }
 0x4cb   :  { %v558_v50 = vsel %vm159_vm2, %v553_v49, -inf }
 0x4cc   :  { %559 = vmax.xlane.f32.xlu2 %v558_v50  ;;  %716 = vmatpush.msrb.mxu0 %v945_v34 }
 0x4d0   :  { %v555_v51 = vpop.f32.mrf.mxu3 }
 0x4d1   :  { %v556_v52 = vadd.f32 %v555_v51, %v1150_v26  ;;  %v665_v28 = vpop.f32.mrf.mxu2 }
 0x4d3   :  { %v561_v53 = vsel %vm159_vm2, %v556_v52, -inf }
 0x4d4   :  { %562 = vmax.xlane.f32.xlu0 %v561_v53  ;;  %v34_v53 = vld [vmem:[%s1368_s4 + $0x18] sm:$0xff] }
 0x4d5   :  { %831 = vmatpush.msrb.mxu3 %v34_v53 }
 0x4d8   :  { %v690_v16 = vpop.f32.mrf.mxu3 }
 0x4e0   :  { %v693_v20 = vpop.f32.mrf.mxu3 }
 0x4e1   :  { %951 = vmatpush.xpose.msk.msrb.mxu1 %vm123_vm1, %v693_v20 }
 0x4e5   :  { %952 = vmatpush.xpose.msk.msrb.mxu1 %vm123_vm1, %v690_v16 }
 0x53f   :  { %v560_v60 = vpop.xlane.xlu2 %559 }
 0x540   :  { %v564_v62 = vsub.f32 %v553_v49, %v560_v60 }
 0x542   :  { %v566_v63 = vmul.f32 1.442695, %v564_v62  ;;  %v962_v62 = vld [vmem:[%s1369_s5] ss:$0 sm:$0xff]  ;;  %s1023_s5 = smov 8  }
 0x544   :  { %979 = vpow2.f32 %v566_v63 }
 0x547   :  { %v563_v0 = vpop.xlane.xlu0 %562 }
 0x548   :  { %v565_v2 = vsub.f32 %v556_v52, %v563_v0 }
 0x54a   :  { %v980_v3 = vpop.eup %979  ;;  %v568_v4 = vmul.f32 1.442695, %v565_v2 }
 0x54b   :  { %v570_v5 = vsel %vm159_vm2, %v980_v3, 0.0 }
 0x54c   :  { %981 = vpow2.f32 %v568_v4  ;;  %571 = vadd.xlane.f32.xlu1 %v570_v5 }
 0x552   :  { %v982_v6 = vpop.eup %981 }
 0x553   :  { %v573_v8 = vsel %vm159_vm2, %v982_v6, 0.0 }
 0x554   :  { %574 = vadd.xlane.f32.xlu2 %v573_v8 }
 0x5bf   :  { %v572_v15 = vpop.xlane.xlu1 %571 }
 0x5c0   :  { %983 = vrcp.f32 %v572_v15 }
 0x5c6   :  { %v984_v17 = vpop.eup %983 }
 0x5c7   :  { %v578_v18 = vmul.f32 %v984_v17, %v980_v3  ;;  %v575_v19 = vpop.xlane.xlu2 %574 }
 0x5c8   :  { %985 = vrcp.f32 %v575_v19 }
 0x5c9   :  { %929 = vmatmul.msk.f32.vlgmr.msra.gmra.mxu0 %vm159_vm2, %v578_v18 }
 0x5ce   :  { %v986_v21 = vpop.eup %985 }
 0x5cf   :  { %v579_v23 = vmul.f32 %v986_v21, %v982_v6 }
 0x5d1   :  { %930 = vmatmul.msk.f32.gmra.mxu0 %vm159_vm2, %v579_v23 }
 0x5d9   :  { %949 = vmatmul.msk.f32.vlgmr.msrb.gmra.mxu0 %vm39_vm0, %v1088_v7 }
 0x5e1   :  { %950 = vmatmul.msk.f32.gmra.mxu0 %vm39_vm0, %v1100_v9 }
 0x646   :  { %v603_v24 = vpop.f32.mrf.mxu0 }
 0x647   :  { %931 = vmatmul.msk.f32.vlgmr.msra.gmra.mxu1 %vm123_vm1, %v603_v24 }
 0x64e   :  { %v606_v25 = vpop.f32.mrf.mxu0 }
 0x64f   :  { %932 = vmatmul.msk.f32.gmra.mxu1 %vm123_vm1, %v606_v25 }
 0x656   :  { %v718_v7 = vpop.f32.mrf.mxu0 }
 0x657   :  { %953 = vmatmul.msk.f32.vlgmr.msrb.gmra.mxu1 %vm123_vm1, %v662_v27 }
 0x65e   :  { %v721_v47 = vpop.f32.mrf.mxu0 }
 0x65f   :  { %954 = vmatmul.msk.f32.gmra.mxu1 %vm123_vm1, %v665_v28  ;;  %801 = vmatpush.msrb.mxu2 %v721_v47 }
 0x661   :  { %802 = vmatpush.msrb.mxu2 %v718_v7 }
 0x6c4   :  { %v632_v33 = vpop.f32.mrf.mxu1 }
 0x6c5   :  { %v638_v35 = vadd.f32 %v632_v33, %v434_v32 }
 0x6cc   :  { %v635_v37 = vpop.f32.mrf.mxu1 }
 0x6cd   :  { %v639_v38 = vadd.f32 %v635_v37, %v437_v36 }
 0x6d4   :  { %v753_v39 = vpop.f32.mrf.mxu1 }
 0x6d5   :  { %v754_v40 = vadd.f32 %v753_v39, %v1141_v22 }
 0x6d7   :  { %v759_v41 = vsel %vm159_vm2, %v754_v40, -inf }
 0x6d8   :  { %760 = vmax.xlane.f32.xlu0 %v759_v41 }
 0x6dc   :  { %v756_v42 = vpop.f32.mrf.mxu1 }
 0x6dd   :  { %v757_v43 = vadd.f32 %v756_v42, %v1150_v26 }
 0x6df   :  { %v762_v44 = vsel %vm159_vm2, %v757_v43, -inf }
 0x6e0   :  { %763 = vmax.xlane.f32.xlu1 %v762_v44 }
 0x74b   :  { %v761_v45 = vpop.xlane.xlu0 %760 }
 0x74c   :  { %v765_v46 = vsub.f32 %v754_v40, %v761_v45 }
 0x74e   :  { %v767_v48 = vmul.f32 1.442695, %v765_v46 }
 0x750   :  { %987 = vpow2.f32 %v767_v48 }
 0x753   :  { %v764_v9 = vpop.xlane.xlu1 %763 }
 0x754   :  { %v766_v49 = vsub.f32 %v757_v43, %v764_v9 }
 0x756   :  { %v988_v22 = vpop.eup %987  ;;  %v769_v50 = vmul.f32 1.442695, %v766_v49 }
 0x757   :  { %v771_v51 = vsel %vm159_vm2, %v988_v22, 0.0 }
 0x758   :  { %989 = vpow2.f32 %v769_v50  ;;  %772 = vadd.xlane.f32.xlu2 %v771_v51 }
 0x75e   :  { %v990_v26 = vpop.eup %989 }
 0x75f   :  { %v774_v52 = vsel %vm159_vm2, %v990_v26, 0.0 }
 0x760   :  { %775 = vadd.xlane.f32.xlu0 %v774_v52 }
 0x7cb   :  { %v773_v54 = vpop.xlane.xlu2 %772 }
 0x7cc   :  { %991 = vrcp.f32 %v773_v54 }
 0x7d2   :  { %v992_v55 = vpop.eup %991 }
 0x7d3   :  { %v779_v56 = vmul.f32 %v992_v55, %v988_v22  ;;  %v776_v57 = vpop.xlane.xlu0 %775 }
 0x7d4   :  { %993 = vrcp.f32 %v776_v57 }
 0x7d5   :  { %955 = vmatmul.msk.f32.vlgmr.msrb.gmra.mxu2 %vm159_vm2, %v779_v56 }
 0x7da   :  { %v994_v58 = vpop.eup %993 }
 0x7db   :  { %v780_v59 = vmul.f32 %v994_v58, %v990_v26 }
 0x7dd   :  { %956 = vmatmul.msk.f32.gmra.mxu2 %vm159_vm2, %v780_v59 }
 0x858   :  { %v804_v60 = vpop.f32.mrf.mxu2 }
 0x859   :  { %957 = vmatmul.msk.f32.vlgmr.msrb.gmra.mxu3 %vm123_vm1, %v804_v60 }
 0x860   :  { %v807_v61 = vpop.f32.mrf.mxu2 }
 0x861   :  { %958 = vmatmul.msk.f32.gmra.mxu3 %vm123_vm1, %v807_v61 }
 0x8dc   :  { %v833_v63 = vpop.f32.mrf.mxu3 }
 0x8dd   :  { %v839_v0 = vadd.f32 %v833_v63, %v638_v35 }
 0x8df   :  { %v845_v1 = vadd.f32 %v962_v62, %v839_v0 }
 0x8e1   :  { %847 = vst.msk [vmem:[#allocation2] sm:$0xff] %vm39_vm0, %v845_v1 }
 0x8e4   :  { %v836_v2 = vpop.f32.mrf.mxu3 }
 0x8e5   :  { %v840_v3 = vadd.f32 %v836_v2, %v639_v38 }
 0x8e7   :  { %v846_v4 = vadd.f32 %v962_v62, %v840_v3 }
 0x8e9   :  { %848 = vst.msk [vmem:[#allocation2 + $0x8] sm:$0xff] %vm39_vm0, %v846_v4 }
 0x8ea   :  { %861 = dma.vmem_to_hbm [thread:$0]  %s854_s13, 256, %s856_s16, [#allocation3], %s1022_s17, %s1022_s17, %s1023_s5  }
 0x8eb   :  { %1019 = dma.done.wait [#allocation3], 256  }
 0x8ec   :  { %1020 = vsyncadd [#allocation3], 4294967040 }
 0x8ed   :  { %866 = vsyncpa [#allocation3], 1 }

</bundles_post_ra>
